<compile_context>
chip_gen: v6e
topology: v6e:2x2x1
jax: 0.10.0
libtpu: 0.0.40
codegen_flags: <defaults>
</compile_context>

<pallas_src>
import functools

import jax
import jax.numpy as jnp
from jax.experimental import pallas as pl
from jax.experimental.pallas import tpu as pltpu

INV_SQRT2 = 0.7071067811865476


def wave_attention_kernel(x_ref, wqkv_ref, wproj_ref, bproj_ref, o_ref,
                          qkv_scr, attn_scr, *, num_heads, high_ratio):
    bb, n, c = x_ref.shape                       # batch-block, tokens, channels
    c2 = wproj_ref.shape[0]                      # dim // 2 (attention width)
    hd = c2 // num_heads
    m = bb * n

    # Collapse (batch-block, tokens) into one GEMM row dimension.
    xf = x_ref[...].reshape(m, c).astype(jnp.float32)          # (m, C), f32

    # ---- high-band IDWT residual: VPU/XLU stencil, no matmul ---------------
    #   res[2k]   = +0.5*high_ratio*(x[2k] - x[2k+1])
    #   res[2k+1] = -0.5*high_ratio*(x[2k] - x[2k+1])
    # neighbor[c] = x[c ^ 1]; the wraparound lanes of each roll are never
    # selected (even lanes take the +1 neighbor, odd lanes the -1 neighbor).
    nxt = pltpu.roll(xf, c - 1, 1)                              # nxt[c] = x[c+1]
    prv = pltpu.roll(xf, 1, 1)                                  # prv[c] = x[c-1]
    lane = jax.lax.broadcasted_iota(jnp.int32, (m, c), 1)
    neighbor = jnp.where((lane & 1) == 0, nxt, prv)
    res = (0.5 * high_ratio) * (xf - neighbor)                  # f32 on the VPU

    # ---- fused (DWT low band + scaled QKV) projection -----------------------
    # Weights pre-folded in the wrapper (row duplication * 1/sqrt2, attention
    # scale on the q columns); bf16 operands / f32 accumulation on the MXU.
    qkv = jnp.dot(xf.astype(jnp.bfloat16), wqkv_ref[...],
                  preferred_element_type=jnp.float32)           # (m, 3*c2)
    qkv_scr[...] = qkv.astype(jnp.bfloat16)                     # bf16 staging

    # ---- per-head attention (small static loop) -----------------------------
    for h in range(num_heads):
        lo = h * hd
        q = qkv_scr[:, lo:lo + hd].reshape(bb, n, hd)
        k = qkv_scr[:, c2 + lo:c2 + lo + hd].reshape(bb, n, hd)
        v = qkv_scr[:, 2 * c2 + lo:2 * c2 + lo + hd].reshape(bb, n, hd)

        # Batched q.k^T (contract last dims, no explicit transpose); scale is
        # already folded into the q weights.
        s = jnp.einsum('bqd,bkd->bqk', q, k,
                       preferred_element_type=jnp.float32)      # (bb, n, n)
        s = s - jnp.max(s, axis=-1, keepdims=True)              # f32 softmax
        p = jnp.exp(s)
        p = p * pl.reciprocal(jnp.sum(p, axis=-1, keepdims=True), approx=True)

        ho = jnp.einsum('bqk,bkd->bqd', p.astype(jnp.bfloat16), v,
                        preferred_element_type=jnp.float32)     # (bb, n, hd)
        attn_scr[:, lo:lo + hd] = ho.reshape(m, hd)             # f32 scratch

    # ---- one projection GEMM (K = C2 fills the MXU), bias + residual -------
    out = jnp.dot(attn_scr[...].astype(jnp.bfloat16), wproj_ref[...],
                  preferred_element_type=jnp.float32)           # (m, C)
    out = out + bproj_ref[...] + res
    o_ref[...] = out.reshape(bb, n, c).astype(o_ref.dtype)


def _vmem_capacity_bytes():
    try:
        return int(pltpu.get_tpu_info().vmem_capacity_bytes)
    except Exception:
        return 64 * 1024 * 1024            # v7x-sized conservative fallback


def wave_attention_res(x, wqkv, wproj, bproj, *, num_heads, high_ratio=1.0,
                       max_block_rows=4096):
    """x: (B, N, C) float32.  Returns (B, N, C) in the original layout."""
    B, N, C = x.shape
    assert C % 2 == 0
    C2 = C // 2
    assert C2 % num_heads == 0
    hd = C2 // num_heads
    scale = hd ** -0.5

    # ---- fold Haar DWT/IDWT + attention scale into the weights (wrapper) ----
    # low = (x_even + x_odd)/sqrt2  ->  duplicate+scale QKV rows; the attention
    # scale is folded into the q columns in f32 BEFORE the bf16 cast.
    wqkv_f32 = wqkv.astype(jnp.float32)
    wqkv_f32 = wqkv_f32.at[:, :C2].multiply(scale)
    wqkv_fold = (jnp.repeat(wqkv_f32, 2, axis=0) * INV_SQRT2).astype(jnp.bfloat16)    # (C, 3*C2)
    # IDWT of the projected low band -> duplicate+scale proj columns / bias.
    wproj_fold = (jnp.repeat(wproj.astype(jnp.float32), 2, axis=1)
                  * INV_SQRT2).astype(jnp.bfloat16)                                   # (C2, C)
    bproj_fold = (jnp.repeat(bproj.astype(jnp.float32), 2, axis=1) * INV_SQRT2)       # (1, C)

    # ---- per-generation VMEM budget and batch-block sizing -------------------
    phys_vmem = _vmem_capacity_bytes()
    vmem_limit = min((phys_vmem * 3) // 4, 100 * 1024 * 1024)   # ~48 MiB v7x, ~96 MiB v5e/v6e

    weight_bytes = 2 * (wqkv_fold.size * 2 + wproj_fold.size * 2) + bproj_fold.size * 4
    # x/out double buffers + bf16/f32 scratches + f32 temporaries + score tiles.
    per_row_bytes = 45 * C + 8 * N
    budget = max(vmem_limit // 2 - weight_bytes, per_row_bytes * N)
    rows = max(N, min(max_block_rows, budget // per_row_bytes))
    bb = max(1, min(B, rows // N))
    # v7x shards the "parallel" grid axis across its two TensorCores: keep >= 2
    # grid steps whenever the batch allows it.
    if B >= 2:
        bb = min(bb, pl.cdiv(B, 2))
    num_blocks = pl.cdiv(B, bb)
    B_pad = num_blocks * bb
    if B_pad != B:
        x = jnp.concatenate([x, jnp.zeros((B_pad - B, N, C), x.dtype)], axis=0)
    # TODO(synk): when B == 1 and N is large, split the token axis across a
    # second grid dimension so v7x's second TensorCore is not idle.
    # TODO(synk): mark the constant-index weight/bias specs with
    # pipeline_mode=pl.Buffered(1) once single-buffer pipeline_mode is verified
    # on the deployment jax version (halves their VMEM footprint).
    # TODO(synk): for dims where C/C2 are not multiples of 128, pad the channel
    # axis wrapper-side so the output stores stay lane-dense.

    m_total = B_pad * N
    flops = int(2 * m_total * C * (3 * C2)              # fused QKV
                + 4 * B_pad * num_heads * N * N * hd    # scores + probs@V
                + 2 * m_total * C2 * C                  # projection
                + 8 * m_total * C)                      # residual / adds
    bytes_accessed = int(2 * m_total * C * x.dtype.itemsize
                         + wqkv_fold.size * 2 + wproj_fold.size * 2
                         + bproj_fold.size * 4)
    cost = pl.CostEstimate(flops=flops,
                           transcendentals=int(B_pad * num_heads * N * N),
                           bytes_accessed=bytes_accessed)

    kernel = functools.partial(wave_attention_kernel,
                               num_heads=num_heads, high_ratio=high_ratio)

    out = pl.pallas_call(
        kernel,
        out_shape=jax.ShapeDtypeStruct((B_pad, N, C), x.dtype),
        grid_spec=pltpu.PrefetchScalarGridSpec(
            num_scalar_prefetch=0,
            grid=(num_blocks,),
            in_specs=[
                pl.BlockSpec((bb, N, C), lambda b: (b, 0, 0)),       # x (lane-dense)
                pl.BlockSpec((C, 3 * C2), lambda b: (0, 0)),         # folded QKV (bf16)
                pl.BlockSpec((C2, C), lambda b: (0, 0)),             # folded proj (bf16)
                pl.BlockSpec((1, C), lambda b: (0, 0)),              # folded bias (f32)
            ],
            out_specs=pl.BlockSpec((bb, N, C), lambda b: (b, 0, 0)),
            scratch_shapes=[
                pltpu.VMEM((bb * N, 3 * C2), jnp.bfloat16),          # staged qkv
                pltpu.VMEM((bb * N, C2), jnp.float32),               # head outputs
            ],
        ),
        compiler_params=pltpu.CompilerParams(
            dimension_semantics=("parallel",),
            vmem_limit_bytes=int(vmem_limit)),
        cost_estimate=cost,
    )(x, wqkv_fold, wproj_fold, bproj_fold)
    if B_pad != B:
        out = out[:B]
    return out


def wave_attention_res_reference(x, wqkv, wproj, bproj, *, num_heads, high_ratio=1.0):
    """Pure-JAX reference mirroring the PyTorch forward (eval mode)."""
    B, N, C = x.shape
    C2 = C // 2
    xp = x.reshape(B, N, C2, 2).astype(jnp.float32)
    low = (xp[..., 0] + xp[..., 1]) * INV_SQRT2
    high = (xp[..., 0] - xp[..., 1]) * INV_SQRT2 * high_ratio

    head_dim = C2 // num_heads
    qkv = jnp.einsum('bnc,cd->bnd', low, wqkv, precision='highest')
    qkv = qkv.reshape(B, N, 3, num_heads, head_dim).transpose(2, 0, 3, 1, 4)
    q, k, v = qkv[0], qkv[1], qkv[2]
    attn = jnp.einsum('bhqd,bhkd->bhqk', q, k, precision='highest') * head_dim ** -0.5
    attn = jax.nn.softmax(attn, axis=-1)
    out = jnp.einsum('bhqk,bhkd->bhqd', attn, v, precision='highest')
    out = out.transpose(0, 2, 1, 3).reshape(B, N, C2)
    new_low = jnp.einsum('bnc,cd->bnd', out, wproj, precision='highest') + bproj[0]

    oe = (new_low + high) * INV_SQRT2
    oo = (new_low - high) * INV_SQRT2
    return jnp.stack([oe, oo], axis=-1).reshape(B, N, C).astype(x.dtype)


if __name__ == "__main__":
    B, N, DIM = 2, 8, 128          # x: (B, N, dim); dim multiple of 128 -> lane-dense
    NUM_HEADS = 4                  # attention runs on dim//2 = 64, head_dim = 16
    HIGH_RATIO = 1.0
    C2 = DIM // 2

    key = jax.random.PRNGKey(0)
    kx, kq, kp, kb = jax.random.split(key, 4)

    x = jax.random.normal(kx, (B, N, DIM), dtype=jnp.float32)
    # Deterministic synthetic parameters (qkv_bias=False; proj has bias).
    w_qkv = jax.random.normal(kq, (C2, 3 * C2), dtype=jnp.float32) * 0.05
    w_proj = jax.random.normal(kp, (C2, C2), dtype=jnp.float32) * 0.05
    b_proj = jax.random.normal(kb, (1, C2), dtype=jnp.float32) * 0.01

    out = wave_attention_res(x, w_qkv, w_proj, b_proj,
                             num_heads=NUM_HEADS, high_ratio=HIGH_RATIO)
    out = jax.block_until_ready(out)

    ref = wave_attention_res_reference(x, w_qkv, w_proj, b_proj,
                                       num_heads=NUM_HEADS, high_ratio=HIGH_RATIO)
    ref = jax.block_until_ready(ref)

    assert out.shape == (B, N, DIM)
    # bf16 MXU operands on the attention path -> relaxed (but still meaningful)
    # tolerance; the high-band / IDWT residual path stays f32.
    assert jnp.allclose(out, ref, rtol=2e-2, atol=2e-2), (
        float(jnp.max(jnp.abs(out - ref))))

    print("KERNEL_OK")
</pallas_src>

<mosaic_0001>
module attributes {stable_mosaic.version = 11 : i64} {
  func.func @wave_attention_kernel(%arg0: i32, %arg1: memref<1x8x128xf32, #tpu.memory_space<vmem>>, %arg2: memref<128x192xbf16, #tpu.memory_space<vmem>>, %arg3: memref<64x128xbf16, #tpu.memory_space<vmem>>, %arg4: memref<1x128xf32, #tpu.memory_space<vmem>>, %arg5: memref<1x8x128xf32, #tpu.memory_space<vmem>>, %arg6: memref<8x192xbf16, #tpu.memory_space<vmem>>, %arg7: memref<8x64xf32, #tpu.memory_space<vmem>>) attributes {dimension_semantics = [#tpu.dimension_semantics<parallel>], iteration_bounds = array<i64: 2>, scalar_prefetch = 0 : i64, scratch_operands = 2 : i64, tpu.core_type = #tpu.core_type<tc>, window_params = [{transform_indices = @transform_0, window_bounds = array<i64: 1, 8, 128>}, {pipeline_mode = #tpu.pipeline_mode<synchronous>, transform_indices = @transform_1, window_bounds = array<i64: 128, 192>}, {pipeline_mode = #tpu.pipeline_mode<synchronous>, transform_indices = @transform_2, window_bounds = array<i64: 64, 128>}, {pipeline_mode = #tpu.pipeline_mode<synchronous>, transform_indices = @transform_3, window_bounds = array<i64: 1, 128>}, {transform_indices = @transform_4, window_bounds = array<i64: 1, 8, 128>}]} {
    %c0 = arith.constant 0 : index
    %c0_0 = arith.constant 0 : index
    %c0_1 = arith.constant 0 : index
    %0 = vector.load %arg1[%c0, %c0_0, %c0_1] : memref<1x8x128xf32, #tpu.memory_space<vmem>>, vector<1x8x128xf32>
    %1 = vector.shape_cast %0 : vector<1x8x128xf32> to vector<8x128xf32>
    %c127_i32 = arith.constant 127 : i32
    %2 = tpu.dynamic_rotate %1 by %c127_i32 dim 1 : vector<8x128xf32>, i32 -> vector<8x128xf32>
    %c1_i32 = arith.constant 1 : i32
    %3 = tpu.dynamic_rotate %1 by %c1_i32 dim 1 : vector<8x128xf32>, i32 -> vector<8x128xf32>
    %4 = tpu.iota {dimensions = array<i32: 1>} : vector<8x128xi32>
    %c1_i32_2 = arith.constant 1 : i32
    %5 = vector.broadcast %c1_i32_2 : i32 to vector<8x128xi32>
    %6 = arith.andi %4, %5 : vector<8x128xi32>
    %c0_i32 = arith.constant 0 : i32
    %7 = vector.broadcast %c0_i32 : i32 to vector<8x128xi32>
    %8 = arith.cmpi eq, %6, %7 : vector<8x128xi32>
    %9 = arith.select %8, %2, %3 : vector<8x128xi1>, vector<8x128xf32>
    %10 = arith.subf %1, %9 : vector<8x128xf32>
    %cst = arith.constant 5.000000e-01 : f32
    %11 = vector.broadcast %cst : f32 to vector<8x128xf32>
    %12 = arith.mulf %11, %10 : vector<8x128xf32>
    %13 = arith.truncf %1 : vector<8x128xf32> to vector<8x128xbf16>
    %c0_3 = arith.constant 0 : index
    %c0_4 = arith.constant 0 : index
    %14 = vector.load %arg2[%c0_3, %c0_4] : memref<128x192xbf16, #tpu.memory_space<vmem>>, vector<128x192xbf16>
    %cst_5 = arith.constant dense<0.000000e+00> : vector<8x192xf32>
    %15 = tpu.matmul %13, %14, %cst_5 {dimension_numbers = #tpu.dot_dimension_numbers<[1], [0], [0], [1], [0, 0, 1, 1], [], []>} : vector<8x128xbf16>, vector<128x192xbf16>, vector<8x192xf32> -> vector<8x192xf32>
    %16 = arith.truncf %15 : vector<8x192xf32> to vector<8x192xbf16>
    %c0_6 = arith.constant 0 : index
    %c0_7 = arith.constant 0 : index
    %17 = vector.load %arg6[%c0_6, %c0_7] : memref<8x192xbf16, #tpu.memory_space<vmem>>, vector<8x192xbf16>
    tpu.vector_store %arg6[%c0_6, %c0_7], %16 {strides = array<i32>} : memref<8x192xbf16, #tpu.memory_space<vmem>>, vector<8x192xbf16>,
    %c0_8 = arith.constant 0 : index
    %c0_9 = arith.constant 0 : index
    %18 = vector.load %arg6[%c0_8, %c0_9] : memref<8x192xbf16, #tpu.memory_space<vmem>>, vector<8x16xbf16>
    %19 = vector.shape_cast %18 : vector<8x16xbf16> to vector<1x8x16xbf16>
    %c0_10 = arith.constant 0 : index
    %c64 = arith.constant 64 : index
    %20 = vector.load %arg6[%c0_10, %c64] : memref<8x192xbf16, #tpu.memory_space<vmem>>, vector<8x16xbf16>
    %21 = vector.shape_cast %20 : vector<8x16xbf16> to vector<1x8x16xbf16>
    %c0_11 = arith.constant 0 : index
    %c128 = arith.constant 128 : index
    %22 = vector.load %arg6[%c0_11, %c128] : memref<8x192xbf16, #tpu.memory_space<vmem>>, vector<8x16xbf16>
    %23 = vector.shape_cast %22 : vector<8x16xbf16> to vector<1x8x16xbf16>
    "tpu.trace_start"() <{level = 10 : i32, message = "bqd,bkd->bqk"}> : () -> ()
    %cst_12 = arith.constant dense<0.000000e+00> : vector<1x8x8xf32>
    %24 = tpu.matmul %19, %21, %cst_12 {dimension_numbers = #tpu.dot_dimension_numbers<[2], [2], [1], [1], [0, 0, 0, 1, 1, 1], [0], [0]>} : vector<1x8x16xbf16>, vector<1x8x16xbf16>, vector<1x8x8xf32> -> vector<1x8x8xf32>
    "tpu.trace_stop"() : () -> ()
    %cst_13 = arith.constant dense<0xFF800000> : vector<1x8xf32>
    %25 = vector.multi_reduction <maximumf>, %24, %cst_13 [2] : vector<1x8x8xf32> to vector<1x8xf32>
    %26 = vector.shape_cast %25 : vector<1x8xf32> to vector<1x8x1xf32>
    %27 = vector.broadcast %26 : vector<1x8x1xf32> to vector<1x8x8xf32>
    %28 = arith.subf %24, %27 : vector<1x8x8xf32>
    %29 = math.exp %28 : vector<1x8x8xf32>
    %cst_14 = arith.constant dense<0.000000e+00> : vector<1x8xf32>
    %30 = vector.multi_reduction <add>, %29, %cst_14 [2] : vector<1x8x8xf32> to vector<1x8xf32>
    %31 = vector.shape_cast %30 : vector<1x8xf32> to vector<1x8x1xf32>
    %32 = tpu.reciprocal %31 {approx = true} : vector<1x8x1xf32> -> vector<1x8x1xf32>
    %33 = vector.broadcast %32 : vector<1x8x1xf32> to vector<1x8x8xf32>
    %34 = arith.mulf %29, %33 : vector<1x8x8xf32>
    %35 = arith.truncf %34 : vector<1x8x8xf32> to vector<1x8x8xbf16>
    "tpu.trace_start"() <{level = 10 : i32, message = "bqk,bkd->bqd"}> : () -> ()
    %cst_15 = arith.constant dense<0.000000e+00> : vector<1x8x16xf32>
    %36 = tpu.matmul %35, %23, %cst_15 {dimension_numbers = #tpu.dot_dimension_numbers<[2], [1], [1], [2], [0, 0, 0, 1, 1, 2], [0], [0]>} : vector<1x8x8xbf16>, vector<1x8x16xbf16>, vector<1x8x16xf32> -> vector<1x8x16xf32>
    "tpu.trace_stop"() : () -> ()
    %37 = vector.shape_cast %36 : vector<1x8x16xf32> to vector<8x16xf32>
    %c0_16 = arith.constant 0 : index
    %c0_17 = arith.constant 0 : index
    %38 = vector.load %arg7[%c0_16, %c0_17] : memref<8x64xf32, #tpu.memory_space<vmem>>, vector<8x16xf32>
    tpu.vector_store %arg7[%c0_16, %c0_17], %37 {strides = array<i32>} : memref<8x64xf32, #tpu.memory_space<vmem>>, vector<8x16xf32>,
    %c0_18 = arith.constant 0 : index
    %c16 = arith.constant 16 : index
    %39 = vector.load %arg6[%c0_18, %c16] : memref<8x192xbf16, #tpu.memory_space<vmem>>, vector<8x16xbf16>
    %40 = vector.shape_cast %39 : vector<8x16xbf16> to vector<1x8x16xbf16>
    %c0_19 = arith.constant 0 : index
    %c80 = arith.constant 80 : index
    %41 = vector.load %arg6[%c0_19, %c80] : memref<8x192xbf16, #tpu.memory_space<vmem>>, vector<8x16xbf16>
    %42 = vector.shape_cast %41 : vector<8x16xbf16> to vector<1x8x16xbf16>
    %c0_20 = arith.constant 0 : index
    %c144 = arith.constant 144 : index
    %43 = vector.load %arg6[%c0_20, %c144] : memref<8x192xbf16, #tpu.memory_space<vmem>>, vector<8x16xbf16>
    %44 = vector.shape_cast %43 : vector<8x16xbf16> to vector<1x8x16xbf16>
    "tpu.trace_start"() <{level = 10 : i32, message = "bqd,bkd->bqk"}> : () -> ()
    %cst_21 = arith.constant dense<0.000000e+00> : vector<1x8x8xf32>
    %45 = tpu.matmul %40, %42, %cst_21 {dimension_numbers = #tpu.dot_dimension_numbers<[2], [2], [1], [1], [0, 0, 0, 1, 1, 1], [0], [0]>} : vector<1x8x16xbf16>, vector<1x8x16xbf16>, vector<1x8x8xf32> -> vector<1x8x8xf32>
    "tpu.trace_stop"() : () -> ()
    %cst_22 = arith.constant dense<0xFF800000> : vector<1x8xf32>
    %46 = vector.multi_reduction <maximumf>, %45, %cst_22 [2] : vector<1x8x8xf32> to vector<1x8xf32>
    %47 = vector.shape_cast %46 : vector<1x8xf32> to vector<1x8x1xf32>
    %48 = vector.broadcast %47 : vector<1x8x1xf32> to vector<1x8x8xf32>
    %49 = arith.subf %45, %48 : vector<1x8x8xf32>
    %50 = math.exp %49 : vector<1x8x8xf32>
    %cst_23 = arith.constant dense<0.000000e+00> : vector<1x8xf32>
    %51 = vector.multi_reduction <add>, %50, %cst_23 [2] : vector<1x8x8xf32> to vector<1x8xf32>
    %52 = vector.shape_cast %51 : vector<1x8xf32> to vector<1x8x1xf32>
    %53 = tpu.reciprocal %52 {approx = true} : vector<1x8x1xf32> -> vector<1x8x1xf32>
    %54 = vector.broadcast %53 : vector<1x8x1xf32> to vector<1x8x8xf32>
    %55 = arith.mulf %50, %54 : vector<1x8x8xf32>
    %56 = arith.truncf %55 : vector<1x8x8xf32> to vector<1x8x8xbf16>
    "tpu.trace_start"() <{level = 10 : i32, message = "bqk,bkd->bqd"}> : () -> ()
    %cst_24 = arith.constant dense<0.000000e+00> : vector<1x8x16xf32>
    %57 = tpu.matmul %56, %44, %cst_24 {dimension_numbers = #tpu.dot_dimension_numbers<[2], [1], [1], [2], [0, 0, 0, 1, 1, 2], [0], [0]>} : vector<1x8x8xbf16>, vector<1x8x16xbf16>, vector<1x8x16xf32> -> vector<1x8x16xf32>
    "tpu.trace_stop"() : () -> ()
    %58 = vector.shape_cast %57 : vector<1x8x16xf32> to vector<8x16xf32>
    %c0_25 = arith.constant 0 : index
    %c16_26 = arith.constant 16 : index
    %59 = vector.load %arg7[%c0_25, %c16_26] : memref<8x64xf32, #tpu.memory_space<vmem>>, vector<8x16xf32>
    tpu.vector_store %arg7[%c0_25, %c16_26], %58 {strides = array<i32>} : memref<8x64xf32, #tpu.memory_space<vmem>>, vector<8x16xf32>,
    %c0_27 = arith.constant 0 : index
    %c32 = arith.constant 32 : index
    %60 = vector.load %arg6[%c0_27, %c32] : memref<8x192xbf16, #tpu.memory_space<vmem>>, vector<8x16xbf16>
    %61 = vector.shape_cast %60 : vector<8x16xbf16> to vector<1x8x16xbf16>
    %c0_28 = arith.constant 0 : index
    %c96 = arith.constant 96 : index
    %62 = vector.load %arg6[%c0_28, %c96] : memref<8x192xbf16, #tpu.memory_space<vmem>>, vector<8x16xbf16>
    %63 = vector.shape_cast %62 : vector<8x16xbf16> to vector<1x8x16xbf16>
    %c0_29 = arith.constant 0 : index
    %c160 = arith.constant 160 : index
    %64 = vector.load %arg6[%c0_29, %c160] : memref<8x192xbf16, #tpu.memory_space<vmem>>, vector<8x16xbf16>
    %65 = vector.shape_cast %64 : vector<8x16xbf16> to vector<1x8x16xbf16>
    "tpu.trace_start"() <{level = 10 : i32, message = "bqd,bkd->bqk"}> : () -> ()
    %cst_30 = arith.constant dense<0.000000e+00> : vector<1x8x8xf32>
    %66 = tpu.matmul %61, %63, %cst_30 {dimension_numbers = #tpu.dot_dimension_numbers<[2], [2], [1], [1], [0, 0, 0, 1, 1, 1], [0], [0]>} : vector<1x8x16xbf16>, vector<1x8x16xbf16>, vector<1x8x8xf32> -> vector<1x8x8xf32>
    "tpu.trace_stop"() : () -> ()
    %cst_31 = arith.constant dense<0xFF800000> : vector<1x8xf32>
    %67 = vector.multi_reduction <maximumf>, %66, %cst_31 [2] : vector<1x8x8xf32> to vector<1x8xf32>
    %68 = vector.shape_cast %67 : vector<1x8xf32> to vector<1x8x1xf32>
    %69 = vector.broadcast %68 : vector<1x8x1xf32> to vector<1x8x8xf32>
    %70 = arith.subf %66, %69 : vector<1x8x8xf32>
    %71 = math.exp %70 : vector<1x8x8xf32>
    %cst_32 = arith.constant dense<0.000000e+00> : vector<1x8xf32>
    %72 = vector.multi_reduction <add>, %71, %cst_32 [2] : vector<1x8x8xf32> to vector<1x8xf32>
    %73 = vector.shape_cast %72 : vector<1x8xf32> to vector<1x8x1xf32>
    %74 = tpu.reciprocal %73 {approx = true} : vector<1x8x1xf32> -> vector<1x8x1xf32>
    %75 = vector.broadcast %74 : vector<1x8x1xf32> to vector<1x8x8xf32>
    %76 = arith.mulf %71, %75 : vector<1x8x8xf32>
    %77 = arith.truncf %76 : vector<1x8x8xf32> to vector<1x8x8xbf16>
    "tpu.trace_start"() <{level = 10 : i32, message = "bqk,bkd->bqd"}> : () -> ()
    %cst_33 = arith.constant dense<0.000000e+00> : vector<1x8x16xf32>
    %78 = tpu.matmul %77, %65, %cst_33 {dimension_numbers = #tpu.dot_dimension_numbers<[2], [1], [1], [2], [0, 0, 0, 1, 1, 2], [0], [0]>} : vector<1x8x8xbf16>, vector<1x8x16xbf16>, vector<1x8x16xf32> -> vector<1x8x16xf32>
    "tpu.trace_stop"() : () -> ()
    %79 = vector.shape_cast %78 : vector<1x8x16xf32> to vector<8x16xf32>
    %c0_34 = arith.constant 0 : index
    %c32_35 = arith.constant 32 : index
    %80 = vector.load %arg7[%c0_34, %c32_35] : memref<8x64xf32, #tpu.memory_space<vmem>>, vector<8x16xf32>
    tpu.vector_store %arg7[%c0_34, %c32_35], %79 {strides = array<i32>} : memref<8x64xf32, #tpu.memory_space<vmem>>, vector<8x16xf32>,
    %c0_36 = arith.constant 0 : index
    %c48 = arith.constant 48 : index
    %81 = vector.load %arg6[%c0_36, %c48] : memref<8x192xbf16, #tpu.memory_space<vmem>>, vector<8x16xbf16>
    %82 = vector.shape_cast %81 : vector<8x16xbf16> to vector<1x8x16xbf16>
    %c0_37 = arith.constant 0 : index
    %c112 = arith.constant 112 : index
    %83 = vector.load %arg6[%c0_37, %c112] : memref<8x192xbf16, #tpu.memory_space<vmem>>, vector<8x16xbf16>
    %84 = vector.shape_cast %83 : vector<8x16xbf16> to vector<1x8x16xbf16>
    %c0_38 = arith.constant 0 : index
    %c176 = arith.constant 176 : index
    %85 = vector.load %arg6[%c0_38, %c176] : memref<8x192xbf16, #tpu.memory_space<vmem>>, vector<8x16xbf16>
    %86 = vector.shape_cast %85 : vector<8x16xbf16> to vector<1x8x16xbf16>
    "tpu.trace_start"() <{level = 10 : i32, message = "bqd,bkd->bqk"}> : () -> ()
    %cst_39 = arith.constant dense<0.000000e+00> : vector<1x8x8xf32>
    %87 = tpu.matmul %82, %84, %cst_39 {dimension_numbers = #tpu.dot_dimension_numbers<[2], [2], [1], [1], [0, 0, 0, 1, 1, 1], [0], [0]>} : vector<1x8x16xbf16>, vector<1x8x16xbf16>, vector<1x8x8xf32> -> vector<1x8x8xf32>
    "tpu.trace_stop"() : () -> ()
    %cst_40 = arith.constant dense<0xFF800000> : vector<1x8xf32>
    %88 = vector.multi_reduction <maximumf>, %87, %cst_40 [2] : vector<1x8x8xf32> to vector<1x8xf32>
    %89 = vector.shape_cast %88 : vector<1x8xf32> to vector<1x8x1xf32>
    %90 = vector.broadcast %89 : vector<1x8x1xf32> to vector<1x8x8xf32>
    %91 = arith.subf %87, %90 : vector<1x8x8xf32>
    %92 = math.exp %91 : vector<1x8x8xf32>
    %cst_41 = arith.constant dense<0.000000e+00> : vector<1x8xf32>
    %93 = vector.multi_reduction <add>, %92, %cst_41 [2] : vector<1x8x8xf32> to vector<1x8xf32>
    %94 = vector.shape_cast %93 : vector<1x8xf32> to vector<1x8x1xf32>
    %95 = tpu.reciprocal %94 {approx = true} : vector<1x8x1xf32> -> vector<1x8x1xf32>
    %96 = vector.broadcast %95 : vector<1x8x1xf32> to vector<1x8x8xf32>
    %97 = arith.mulf %92, %96 : vector<1x8x8xf32>
    %98 = arith.truncf %97 : vector<1x8x8xf32> to vector<1x8x8xbf16>
    "tpu.trace_start"() <{level = 10 : i32, message = "bqk,bkd->bqd"}> : () -> ()
    %cst_42 = arith.constant dense<0.000000e+00> : vector<1x8x16xf32>
    %99 = tpu.matmul %98, %86, %cst_42 {dimension_numbers = #tpu.dot_dimension_numbers<[2], [1], [1], [2], [0, 0, 0, 1, 1, 2], [0], [0]>} : vector<1x8x8xbf16>, vector<1x8x16xbf16>, vector<1x8x16xf32> -> vector<1x8x16xf32>
    "tpu.trace_stop"() : () -> ()
    %100 = vector.shape_cast %99 : vector<1x8x16xf32> to vector<8x16xf32>
    %c0_43 = arith.constant 0 : index
    %c48_44 = arith.constant 48 : index
    %101 = vector.load %arg7[%c0_43, %c48_44] : memref<8x64xf32, #tpu.memory_space<vmem>>, vector<8x16xf32>
    tpu.vector_store %arg7[%c0_43, %c48_44], %100 {strides = array<i32>} : memref<8x64xf32, #tpu.memory_space<vmem>>, vector<8x16xf32>,
    %c0_45 = arith.constant 0 : index
    %c0_46 = arith.constant 0 : index
    %102 = vector.load %arg7[%c0_45, %c0_46] : memref<8x64xf32, #tpu.memory_space<vmem>>, vector<8x64xf32>
    %103 = arith.truncf %102 : vector<8x64xf32> to vector<8x64xbf16>
    %c0_47 = arith.constant 0 : index
    %c0_48 = arith.constant 0 : index
    %104 = vector.load %arg3[%c0_47, %c0_48] : memref<64x128xbf16, #tpu.memory_space<vmem>>, vector<64x128xbf16>
    %cst_49 = arith.constant dense<0.000000e+00> : vector<8x128xf32>
    %105 = tpu.matmul %103, %104, %cst_49 {dimension_numbers = #tpu.dot_dimension_numbers<[1], [0], [0], [1], [0, 0, 1, 1], [], []>} : vector<8x64xbf16>, vector<64x128xbf16>, vector<8x128xf32> -> vector<8x128xf32>
    %c0_50 = arith.constant 0 : index
    %c0_51 = arith.constant 0 : index
    %106 = vector.load %arg4[%c0_50, %c0_51] : memref<1x128xf32, #tpu.memory_space<vmem>>, vector<1x128xf32>
    %107 = vector.broadcast %106 : vector<1x128xf32> to vector<8x128xf32>
    %108 = arith.addf %105, %107 : vector<8x128xf32>
    %109 = arith.addf %108, %12 : vector<8x128xf32>
    %110 = vector.shape_cast %109 : vector<8x128xf32> to vector<1x8x128xf32>
    %c0_52 = arith.constant 0 : index
    %c0_53 = arith.constant 0 : index
    %c0_54 = arith.constant 0 : index
    %111 = vector.load %arg5[%c0_52, %c0_53, %c0_54] : memref<1x8x128xf32, #tpu.memory_space<vmem>>, vector<1x8x128xf32>
    tpu.vector_store %arg5[%c0_52, %c0_53, %c0_54], %110 {strides = array<i32>} : memref<1x8x128xf32, #tpu.memory_space<vmem>>, vector<1x8x128xf32>,
    return
  }
  func.func @transform_0(%arg0: i32) -> (i32, i32, i32) {
    %c0_i32 = arith.constant 0 : i32
    %c0_i32_0 = arith.constant 0 : i32
    %c0_i32_1 = arith.constant 0 : i32
    return %arg0, %c0_i32, %c0_i32_0 : i32, i32, i32
  }
  func.func @transform_1(%arg0: i32) -> (i32, i32) {
    %c0_i32 = arith.constant 0 : i32
    %c0_i32_0 = arith.constant 0 : i32
    %c0_i32_1 = arith.constant 0 : i32
    return %c0_i32, %c0_i32_0 : i32, i32
  }
  func.func @transform_2(%arg0: i32) -> (i32, i32) {
    %c0_i32 = arith.constant 0 : i32
    %c0_i32_0 = arith.constant 0 : i32
    %c0_i32_1 = arith.constant 0 : i32
    return %c0_i32, %c0_i32_0 : i32, i32
  }
  func.func @transform_3(%arg0: i32) -> (i32, i32) {
    %c0_i32 = arith.constant 0 : i32
    %c0_i32_0 = arith.constant 0 : i32
    %c0_i32_1 = arith.constant 0 : i32
    return %c0_i32, %c0_i32_0 : i32, i32
  }
  func.func @transform_4(%arg0: i32) -> (i32, i32, i32) {
    %c0_i32 = arith.constant 0 : i32
    %c0_i32_0 = arith.constant 0 : i32
    %c0_i32_1 = arith.constant 0 : i32
    return %arg0, %c0_i32, %c0_i32_0 : i32, i32, i32
  }
}

</mosaic_0001>

<bundles_post_ra>
// kernel: tpu_custom_call.1
= control target key start
LH: loop header
LB: loop body
LE: loop exit
PB: predicated region body
PF: predicated region fallthrough
CT: control target
= control target key end

     0   :  { %9 = vsyncpa [#allocation5], 0  ;;  %s1569_s0 = inlined_call_operand.vmem [shape: f32[2,8,128], index: 0, kind: input, shape index: {}]   ;;  %s1570_s1 = inlined_call_operand.vmem [shape: bf16[128,192], index: 1, kind: input, shape index: {}]   ;;  %s1571_s2 = inlined_call_operand.vmem [shape: bf16[64,128], index: 2, kind: input, shape index: {}]   ;;  %s1572_s3 = inlined_call_operand.vmem [shape: f32[1,128], index: 3, kind: input, shape index: {}]   ;;  %s1573_s4 = inlined_call_operand.hbm [shape: f32[2,8,128], index: 4, kind: output, shape index: {}]  }
   0x1   :  { %11 = vsyncpa [#allocation5 + $0x1], 0  ;;  %s1334_s15 = smov 0   ;;  %s1336_s16 = smov 0  }
   0x2   :  { %s1338_s17 = smov 0   ;;  %s1340_s18 = smov 0  }
   0x3 LB: > { %s1355_s19 = sadd.s32 4294967295, %s1294_s18   ;;  %s1002_s20 = sadd.s32 4294967294, %s1294_s18   ;;  %s1294_s18 = sphi %s1340_s18, %s1579_s18   ;;  %s1290_s17 = sphi %s1338_s17, %s1578_s17   ;;  %s1286_s16 = sphi %s1336_s16, %s1577_s16   ;;  %s1282_s15 = sphi %s1334_s15, %s1576_s15  }
   0x4   : > { %s1359_s21 = sadd.s32 1, %s1294_s18   ;;  %s113_s22 = sadd.s32 1, %s1290_s17 }
   0x5   : > { %s110_s23 = ssub.s32 %s1294_s18, %s1359_s21  ;;  %p123_p0 = scmp.ne.s32.totalorder %s1290_s17, %s1286_s16 }
   0x6   : > { %p111_p1 = scmp.eq.s32.totalorder %s110_s23, 0  ;;  %p124_p2 = scmp.eq.s32.totalorder %s1355_s19, 1 }
   0x7   : > { %p129_p3 = scmp.ne.s32.totalorder %s1286_s16, %s1282_s15  ;;  %p130_p4 = scmp.eq.s32.totalorder %s1002_s20, 1 }
   0x8   : > { %s1370_s24 = scalar_select %p111_p1, %s1290_s17, %s113_s22  }
   0x9   : > { %p1372_p5 = por %p124_p2, %p123_p0  ;;  %p1376_p6 = por %p130_p4, %p129_p3 }
   0xa   : > { %p1005_p7 = scmp.ge.s32.totalorder %s1294_s18, 1  ;;  %p164_p8 = scmp.lt.s32.totalorder %s1294_s18, 3 }
   0xc   : > { %p165_p9 = pnand %p1005_p7, %p164_p8 }
   0xd   : > { %p189_p10 = scmp.lt.s32.totalorder (!%p165_p9), %s1355_s19, 1  ;;  %s1299_s30 = smov (!%p165_p9), 64  }
   0xe   : > { %168 = sbr.rel (%p165_p9) target bundleno = 2456 (0x998), region = 36  ;;  %s1300_s5 = smov (!%p165_p9), 112  }
   0xf   : > { %s1302_s7 = smov (!%p165_p9), 96   ;;  %s1303_s8 = smov (!%p165_p9), 32  }
  0x10   : > { %s1304_s9 = smov (!%p165_p9), 16   ;;  %s1305_s10 = smov (!%p165_p9), 80  }
  0x11   : > { %s1306_s28 = smov (!%p165_p9), 127   ;;  %s1307_s29 = smov (!%p165_p9), 1  }
  0x12   : > { %s1308_s20 = smov (!%p165_p9), [#allocation4]  }
  0x13   : > { %v1183_v0 = vld [vmem:[%s1570_s1 + $0x74] ss:$8 sps:$4 sm:$0xff]   ;;  %v1185_v1 = vld [vmem:[%s1570_s1 + $0x70] ss:$8 sps:$4 sm:$0xff]   ;;  %v1296_v2 = vmov 0   ;;  %s190_s6 = scalar_select %p189_p10, %s1355_s19, 1 }
  0x14   : > { %335 = vmatprep.mubr.bf16.mxu0 %v1296_v2  ;;  %303 = vmatprep.subr.bf16.mxu0 %v1183_v0  ;;  %v1186_v3 = vld [vmem:[%s1570_s1 + $0x64] ss:$8 sps:$4 sm:$0xff]   ;;  %v1188_v4 = vld [vmem:[%s1570_s1 + $0x60] ss:$8 sps:$4 sm:$0xff]   ;;  %v1189_v5 = vld [vmem:[%s1570_s1 + $0x54] ss:$8 sps:$4 sm:$0xff]  }
  0x15   : > { %304 = vmatpush1.bf16.msra.mxu0 %v1185_v1  ;;  %v1191_v6 = vld [vmem:[%s1570_s1 + $0x50] ss:$8 sps:$4 sm:$0xff]   ;;  %v1192_v7 = vld [vmem:[%s1570_s1 + $0x44] ss:$8 sps:$4 sm:$0xff]   ;;  %v1194_v8 = vld [vmem:[%s1570_s1 + $0x40] ss:$8 sps:$4 sm:$0xff]  }
  0x16   : > { %305 = vmatprep.subr.bf16.mxu0 %v1186_v3  ;;  %v1195_v9 = vld [vmem:[%s1570_s1 + $0x34] ss:$8 sps:$4 sm:$0xff]   ;;  %v1197_v10 = vld [vmem:[%s1570_s1 + $0x30] ss:$8 sps:$4 sm:$0xff]   ;;  %v1198_v11 = vld [vmem:[%s1570_s1 + $0x24] ss:$8 sps:$4 sm:$0xff]  }
  0x17   : > { %v1200_v12 = vld [vmem:[%s1570_s1 + $0x20] ss:$8 sps:$4 sm:$0xff]   ;;  %v1201_v13 = vld [vmem:[%s1570_s1 + $0x14] ss:$8 sps:$4 sm:$0xff]   ;;  %s1007_s11 = sshll.u32 %s190_s6, 3  ;;  %vm352_vm0 = vcmask 1043456  }
  0x18   : > { %v1203_v14 = vld [vmem:[%s1570_s1 + $0x10] ss:$8 sps:$4 sm:$0xff]   ;;  %v1204_v15 = vld [vmem:[%s1570_s1 + $0x4] ss:$8 sps:$4 sm:$0xff]   ;;  %s192_s27 = scalar_lea.vmem %s1569_s0, %s1007_s11  ;;  %v1206_v16 = vld [vmem:[%s1570_s1] ss:$8 sps:$4 sm:$0xff]  }
  0x19   : > { %306 = vmatpush1.bf16.msra.mxu0 %v1188_v4  ;;  %v1435_v17 = vld [vmem:[%s192_s27] sm:$0xff]  ;;  %vm353_vm1 = vcmask 523268   ;;  %v1297_v21 = vmov 0.0   ;;  %vm1298_vm3 = vmmov 0   ;;  %vm363_vm4 = vcmask 130048   ;;  %s1301_s6 = smov 48  }
  0x1a   : > { %307 = vmatprep.subr.bf16.mxu0 %v1189_v5  ;;  %v206_v18 = vpack.c.bf16 %v1435_v17, %v1435_v17  ;;  %vm354_vm2 = vmor %vm353_vm1, %vm352_vm0  ;;  %1072 = vmatprep.subr.bf16.mxu1 %v1297_v21  ;;  %vm410_vm5 = vcmask 64512   ;;  %vm592_vm6 = vcmask 261248   ;;  %vm716_vm7 = vcmask 392448   ;;  %s1238_s22 = sshll.u32 %s1308_s20, 4  ;;  %s1239_s22 = int_to_ptr.vmem [resolvable:$false] %s1238_s22 }
  0x1b   : > { %1074 = vmatprep.mubr.msk.bf16.mxu1 %vm1298_vm3, %v1297_v21  ;;  %vm840_vm8 = vcmask 523648   ;;  %vm883_vm9 = vcmask 523264   ;;  %s1240_s23 = scalar_lea.vmem %s1239_s22, 256 }
  0x1d   : > { %308 = vmatpush1.bf16.msra.mxu0 %v1191_v6 }
  0x1e   : > { %309 = vmatprep.subr.bf16.mxu0 %v1192_v7 }
  0x21   : > { %310 = vmatpush1.bf16.msra.mxu0 %v1194_v8 }
  0x22   : > { %311 = vmatprep.subr.bf16.mxu0 %v1195_v9 }
  0x25   : > { %312 = vmatpush1.bf16.msra.mxu0 %v1197_v10 }
  0x26   : > { %313 = vmatprep.subr.bf16.mxu0 %v1198_v11 }
  0x29   : > { %314 = vmatpush1.bf16.msra.mxu0 %v1200_v12 }
  0x2a   : > { %315 = vmatprep.subr.bf16.mxu0 %v1201_v13 }
  0x2d   : > { %316 = vmatpush1.bf16.msra.mxu0 %v1203_v14 }
  0x2e   : > { %317 = vmatprep.subr.bf16.mxu0 %v1204_v15 }
  0x31   : > { %318 = vmatpush1.bf16.msra.mxu0 %v1206_v16 }
  0x32   : > { %1108 = vmatprep.subr.bf16.mxu0 %v1297_v21 }
  0x34   : > { %336 = vmatmul.mubr.bf16.vlgmr.msra.gmra.mxu0 %v206_v18 }
  0x35   : > { %1110 = vmatprep.mubr.msk.bf16.mxu0 %vm1298_vm3, %v1297_v21 }
  0xf4   : > { %v337_v19 = vpop.f32.mrf.mxu0 }
  0xf6   : > { %v339_v20 = vpop.f32.mrf.mxu0 }
  0xf7   : > { %v1050_v22 = vpack.c.bf16 %v339_v20, %v337_v19 }
  0xf8   : > { %v341_v23 = vpop.f32.mrf.mxu0 }
  0xf9   : > { %355 = vst.msk [vmem:[#allocation2] sm:$0xff] %vm354_vm2, %v1050_v22 }
  0xfa   : > { %v342_v24 = vpop.f32.mrf.mxu0 }
 0x100   : > { %v356_v25 = vld [vmem:[#allocation2] sm:$0xf]  ;;  %v357_v29 = vld [vmem:[#allocation2 + $0x4] sm:$0xf] }
 0x101   : > { %v1025_v26 = vcombine.low %v356_v25, %v356_v25  ;;  %v427_v30 = vsel %vm352_vm0, %v357_v29, 0  ;;  %v1208_v36 = vld [vmem:[#allocation2 + $0x4] ss:$0 sps:$4 sm:$0xff]   ;;  %v1209_v42 = vld [vmem:[#allocation2] ss:$0 sps:$4 sm:$0xff]  }
 0x102   : > { %v1210_v61 = vld [vmem:[#allocation2] ss:$0 sps:$4 sm:$0xff]  }
 0x103   : > { %361 = vrot.lane.b32.xlu0 %v1025_v26, %s1299_s30  ;;  %v1211_v3 = vld [vmem:[#allocation2] ss:$0 sps:$4 sm:$0xff]   ;;  %s186_s30 = sand.u32 1, %s1286_s16  }
 0x104   : > { %s930_s14 = scalar_lea.sflag [#allocation5], %s186_s30 }
 0x175   : > { %v362_v27 = vpop.permute.xlu0 %361 }
 0x176   : > { %v368_v28 = vsel %vm363_vm4, %v362_v27, 0 }
 0x177   : > { %1073 = vmatpush3.bf16.xpose.msra.mxu1 %v368_v28 }
 0x178   : > { %1078 = vmatprep.subr.bf16.mxu1 %v1297_v21 }
 0x17e   : > { %1075 = vmatmul.mubr.msk.bf16.vlgmr.msra.gmra.mxu1 %vm363_vm4, %v356_v25 }
 0x17f   : > { %1079 = vmatpush3.bf16.msra.mxu1 %v427_v30  ;;  %1080 = vmatprep.mubr.msk.bf16.mxu1 %vm1298_vm3, %v1297_v21  ;;  %v1212_v30 = vld [vmem:[#allocation2 + $0x4] ss:$0 sps:$4 sm:$0xff]  }
 0x180   : > { %1084 = vmatprep.subr.bf16.mxu1 %v1297_v21 }
 0x23e   : > { %v404_v31 = vpop.f32.mrf.mxu1 }
 0x23f   : > { %v411_v32 = vsel %vm410_vm5, %v404_v31, -inf }
 0x240   : > { %412 = vmax.xlane.f32.xlu0 %v411_v32  ;;  %v1076_v33 = vpop.f32.mrf.mxu1 }
 0x242   : > { %v407_v34 = vpop.f32.mrf.mxu1 }
 0x244   : > { %v1077_v35 = vpop.f32.mrf.mxu1 }
 0x256   : > { %540 = vrot.lane.b32.xlu0 %v1208_v36, %s1300_s5 }
 0x2c9   : > { %v413_v37 = vpop.xlane.xlu0 %412 }
 0x2ca   : > { %v414_v38 = vsub.f32 %v404_v31, %v413_v37 }
 0x2cc   : > { %v415_v39 = vmul.f32 1.442695, %v414_v38 }
 0x2cd   : > { %v541_v49 = vpop.permute.xlu0 %540 }
 0x2ce   : > { %1218 = vpow2.f32 %v415_v39  ;;  %v546_v51 = vsel %vm352_vm0, %v541_v49, 0 }
 0x2db   : > { %v1219_v40 = vpop.eup %1218 }
 0x2dc   : > { %v417_v41 = vsel %vm410_vm5, %v1219_v40, 0.0 }
 0x2dd   : > { %418 = vadd.xlane.f32.xlu1 %v417_v41 }
 0x2ee   : > { %477 = vrot.lane.b32.xlu1 %v1209_v42, %s1301_s6 }
 0x2f2   : > { %475 = vrot.lane.b32.xlu1 %v1209_v42, %s1300_s5  ;;  %s1006_s5 = sshll.u32 %s186_s30, 3 }
 0x366   : > { %v419_v43 = vpop.xlane.xlu1 %418 }
 0x367   : > { %1220 = vrcp.f32 %v419_v43  ;;  %v1213_v43 = vld [vmem:[#allocation2 + $0x4] ss:$0 sps:$4 sm:$0xff]  }
 0x36a   : > { %v478_v46 = vpop.permute.xlu1 %477 }
 0x36b   : > { %v483_v48 = vsel %vm363_vm4, %v478_v46, 0 }
 0x36e   : > { %v476_v50 = vpop.permute.xlu1 %475 }
 0x374   : > { %v1221_v44 = vpop.eup %1220 }
 0x375   : > { %v421_v45 = vmul.f32 %v1221_v44, %v1219_v40 }
 0x377   : > { %v422_v47 = vpack.c.bf16 %v421_v45, %v421_v45 }
 0x379   : > { %1081 = vmatmul.mubr.msk.bf16.vlgmr.msra.gmra.mxu1 %vm410_vm5, %v422_v47 }
 0x37a   : > { %1085 = vmatpush3.bf16.xpose.msra.mxu1 %v483_v48  ;;  %1086 = vmatprep.mubr.msk.bf16.mxu1 %vm1298_vm3, %v1297_v21 }
 0x37b   : > { %1090 = vmatprep.subr.bf16.mxu1 %v1297_v21 }
 0x381   : > { %1087 = vmatmul.mubr.msk.bf16.vlgmr.msra.gmra.mxu1 %vm363_vm4, %v476_v50 }
 0x382   : > { %1091 = vmatpush3.bf16.msra.mxu1 %v546_v51  ;;  %1092 = vmatprep.mubr.msk.bf16.mxu1 %vm1298_vm3, %v1297_v21 }
 0x383   : > { %1096 = vmatprep.subr.bf16.mxu1 %v1297_v21 }
 0x439   : > { %v463_v52 = vpop.f32.mrf.mxu1 }
 0x43a   : > { %469 = vst.msk [vmem:[#allocation3] sm:$0xff] %vm363_vm4, %v463_v52 }
 0x43b   : > { %v1082_v53 = vpop.f32.mrf.mxu1 }
 0x43d   : > { %v466_v54 = vpop.f32.mrf.mxu1 }
 0x43f   : > { %v1083_v55 = vpop.f32.mrf.mxu1 }
 0x440   : > { %v1214_v55 = vld [vmem:[%s1571_s2 + $0x18] sm:$0xff]  }
 0x441   : > { %v519_v56 = vpop.f32.mrf.mxu1 }
 0x442   : > { %v525_v57 = vsel %vm410_vm5, %v519_v56, -inf }
 0x443   : > { %526 = vmax.xlane.f32.xlu1 %v525_v57  ;;  %v1088_v58 = vpop.f32.mrf.mxu1  ;;  %v1216_v57 = vld [vmem:[%s1571_s2 + $0x8] sm:$0xff]  }
 0x444   : > { %v1217_v58 = vld [vmem:[%s1571_s2] sm:$0xff]  }
 0x445   : > { %v522_v59 = vpop.f32.mrf.mxu1 }
 0x447   : > { %v1089_v60 = vpop.f32.mrf.mxu1 }
 0x454   : > { %599 = vrot.lane.b32.xlu1 %v1210_v61, %s1302_s7 }
 0x4cc   : > { %v527_v62 = vpop.xlane.xlu1 %526 }
 0x4cd   : > { %v528_v63 = vsub.f32 %v519_v56, %v527_v62  ;;  %v1215_v56 = vld [vmem:[%s1571_s2 + $0x10] sm:$0xff]  }
 0x4cf   : > { %v529_v0 = vmul.f32 1.442695, %v528_v63 }
 0x4d0   : > { %v600_v13 = vpop.permute.xlu1 %599 }
 0x4d1   : > { %1222 = vpow2.f32 %v529_v0 }
 0x4de   : > { %v1223_v1 = vpop.eup %1222 }
 0x4df   : > { %v531_v2 = vsel %vm410_vm5, %v1223_v1, 0.0 }
 0x4e0   : > { %532 = vadd.xlane.f32.xlu0 %v531_v2 }
 0x4f6   : > { %601 = vrot.lane.b32.xlu0 %v1210_v61, %s1303_s8 }
 0x4fa   : > { %725 = vrot.lane.b32.xlu0 %v1211_v3, %s1304_s9 }
 0x4fe   : > { %723 = vrot.lane.b32.xlu0 %v1211_v3, %s1305_s10 }
 0x569   : > { %v533_v4 = vpop.xlane.xlu0 %532 }
 0x56a   : > { %1224 = vrcp.f32 %v533_v4 }
 0x56d   : > { %v602_v5 = vpop.permute.xlu0 %601 }
 0x56e   : > { %v607_v12 = vsel %vm363_vm4, %v602_v5, 0 }
 0x571   : > { %v726_v6 = vpop.permute.xlu0 %725 }
 0x572   : > { %v731_v7 = vsel %vm363_vm4, %v726_v6, 0  ;;  %v199_v6 = vlaneseq }
 0x573   : > { %1109 = vmatpush3.bf16.xpose.msra.mxu0 %v731_v7 }
 0x574   : > { %1120 = vmatprep.subr.bf16.mxu0 %v1297_v21  ;;  %v200_v7 = vand.u32 127, %v199_v6 }
 0x575   : > { %v724_v10 = vpop.permute.xlu0 %723 }
 0x577   : > { %v1225_v8 = vpop.eup %1224 }
 0x578   : > { %v535_v9 = vmul.f32 %v1225_v8, %v1223_v1  ;;  %v201_v8 = vand.u32 1, %v200_v7 }
 0x57a   : > { %1111 = vmatmul.mubr.msk.bf16.vlgmr.msra.gmra.mxu0 %vm363_vm4, %v724_v10  ;;  %v536_v11 = vpack.c.bf16 %v535_v9, %v535_v9  ;;  %vm202_vm10 = vcmp.eq.s32.totalorder %v201_v8, 0 }
 0x57b   : > { %1128 = vmatprep.mubr.msk.bf16.mxu0 %vm1298_vm3, %v1297_v21  ;;  %1121 = vmatpush3.bf16.msra.mxu0 %v1214_v55 }
 0x57c   : > { %1093 = vmatmul.mubr.msk.bf16.vlgmr.msra.gmra.mxu1 %vm410_vm5, %v536_v11  ;;  %1122 = vmatprep.subr.bf16.mxu0 %v1297_v21 }
 0x57d   : > { %1097 = vmatpush3.bf16.xpose.msra.mxu1 %v607_v12  ;;  %1098 = vmatprep.mubr.msk.bf16.mxu1 %vm1298_vm3, %v1297_v21 }
 0x57e   : > { %1102 = vmatprep.subr.bf16.mxu1 %v1297_v21 }
 0x57f   : > { %1123 = vmatpush3.bf16.msra.mxu0 %v1215_v56 }
 0x580   : > { %1124 = vmatprep.subr.bf16.mxu0 %v1297_v21 }
 0x583   : > { %1125 = vmatpush3.bf16.msra.mxu0 %v1216_v57 }
 0x584   : > { %1099 = vmatmul.mubr.msk.bf16.vlgmr.msra.gmra.mxu1 %vm363_vm4, %v600_v13  ;;  %1126 = vmatprep.subr.bf16.mxu0 %v1297_v21  ;;  %v1040_v13 = vld [vmem:[%s1572_s3] ss:$0 sm:$0xff] }
 0x585   : > { %1104 = vmatprep.mubr.msk.bf16.mxu1 %vm1298_vm3, %v1297_v21 }
 0x587   : > { %1127 = vmatpush3.bf16.msra.mxu0 %v1217_v58 }
 0x63a   : > { %v767_v14 = vpop.f32.mrf.mxu0 }
 0x63b   : > { %v773_v15 = vsel %vm410_vm5, %v767_v14, -inf }
 0x63c   : > { %v582_v16 = vpop.f32.mrf.mxu1  ;;  %774 = vmax.xlane.f32.xlu1 %v773_v15  ;;  %v1112_v18 = vpop.f32.mrf.mxu0 }
 0x63e   : > { %v1094_v19 = vpop.f32.mrf.mxu1  ;;  %v770_v20 = vpop.f32.mrf.mxu0 }
 0x640   : > { %v585_v22 = vpop.f32.mrf.mxu1  ;;  %v1113_v23 = vpop.f32.mrf.mxu0 }
 0x642   : > { %v1095_v24 = vpop.f32.mrf.mxu1 }
 0x644   : > { %v643_v25 = vpop.f32.mrf.mxu1 }
 0x645   : > { %v649_v26 = vsel %vm410_vm5, %v643_v25, -inf }
 0x646   : > { %650 = vmax.xlane.f32.xlu0 %v649_v26  ;;  %v1100_v27 = vpop.f32.mrf.mxu1 }
 0x648   : > { %v646_v28 = vpop.f32.mrf.mxu1 }
 0x64a   : > { %v1101_v29 = vpop.f32.mrf.mxu1 }
 0x64d   : > { %788 = vrot.lane.b32.xlu1 %v1212_v30, %s1305_s10 }
 0x651   : > { %589 = vrot.lane.b32.xlu1 %v582_v16, %s1304_s9  ;;  %s188_s9 = scalar_lea.vmem [#allocation4], %s1006_s5 }
 0x652   : > { %s943_s10 = sshll.u32 %s188_s9, 4  ;;  %s1530_s10 = int_to_ptr.vmem [resolvable:$true] %s943_s10 }
 0x653   : > { %p1241_p0 = scmp.lt.s32.totalorder %s1530_s10, %s1239_s22 }
 0x6c5   : > { %v775_v31 = vpop.xlane.xlu1 %774 }
 0x6c6   : > { %v776_v32 = vsub.f32 %v767_v14, %v775_v31 }
 0x6c8   : > { %v777_v33 = vmul.f32 1.442695, %v776_v32 }
 0x6c9   : > { %v789_v34 = vpop.permute.xlu1 %788 }
 0x6ca   : > { %1226 = vpow2.f32 %v777_v33  ;;  %v794_v52 = vsel %vm352_vm0, %v789_v34, 0 }
 0x6cd   : > { %v590_v35 = vpop.permute.xlu1 %589 }
 0x6ce   : > { %593 = vst.msk [vmem:[#allocation3] sm:$0xff] %vm592_vm6, %v590_v35 }
 0x6cf   : > { %v651_v36 = vpop.xlane.xlu0 %650 }
 0x6d0   : > { %v652_v37 = vsub.f32 %v643_v25, %v651_v36 }
 0x6d2   : > { %v653_v38 = vmul.f32 1.442695, %v652_v37 }
 0x6d4   : > { %1228 = vpow2.f32 %v653_v38 }
 0x6d7   : > { %v1227_v39 = vpop.eup %1226 }
 0x6d8   : > { %v779_v40 = vsel %vm410_vm5, %v1227_v39, 0.0 }
 0x6d9   : > { %780 = vadd.xlane.f32.xlu0 %v779_v40 }
 0x6e1   : > { %v1229_v41 = vpop.eup %1228 }
 0x6e2   : > { %v655_v42 = vsel %vm410_vm5, %v1229_v41, 0.0 }
 0x6e3   : > { %656 = vadd.xlane.f32.xlu0 %v655_v42 }
 0x6f9   : > { %664 = vrot.lane.b32.xlu0 %v1213_v43, %s1302_s7 }
 0x762   : > { %v781_v44 = vpop.xlane.xlu0 %780 }
 0x76c   : > { %v657_v45 = vpop.xlane.xlu0 %656 }
 0x76d   : > { %1230 = vrcp.f32 %v657_v45 }
 0x76e   : > { %1232 = vrcp.f32 %v781_v44 }
 0x770   : > { %v665_v46 = vpop.permute.xlu0 %664 }
 0x771   : > { %v670_v47 = vsel %vm352_vm0, %v665_v46, 0 }
 0x772   : > { %1103 = vmatpush3.bf16.msra.mxu1 %v670_v47 }
 0x773   : > { %1114 = vmatprep.subr.bf16.mxu1 %v1297_v21 }
 0x77a   : > { %v1231_v48 = vpop.eup %1230 }
 0x77b   : > { %v659_v49 = vmul.f32 %v1231_v48, %v1229_v41  ;;  %v1233_v51 = vpop.eup %1232 }
 0x77c   : > { %v783_v53 = vmul.f32 %v1233_v51, %v1227_v39 }
 0x77d   : > { %v660_v50 = vpack.c.bf16 %v659_v49, %v659_v49 }
 0x77e   : > { %v784_v54 = vpack.c.bf16 %v783_v53, %v783_v53 }
 0x77f   : > { %1105 = vmatmul.mubr.msk.bf16.vlgmr.msra.gmra.mxu1 %vm410_vm5, %v660_v50 }
 0x780   : > { %1115 = vmatpush3.bf16.msra.mxu1 %v794_v52  ;;  %1116 = vmatprep.mubr.msk.bf16.mxu1 %vm1298_vm3, %v1297_v21 }
 0x787   : > { %1117 = vmatmul.mubr.msk.bf16.vlgmr.msra.gmra.mxu1 %vm410_vm5, %v784_v54 }
 0x83f   : > { %v706_v59 = vpop.f32.mrf.mxu1 }
 0x840   : > { %713 = vrot.lane.b32.xlu0 %v706_v59, %s1303_s8  ;;  %s1047_s8 = sshll.u32 %s1355_s19, 7  ;;  %s1234_s19 = scalar_lea.vmem %s1530_s10, 128 }
 0x841   : > { %v1106_v60 = vpop.f32.mrf.mxu1  ;;  %s1528_s13 = scalar_lea.hbm %s1573_s4, %s1047_s8  ;;  %p1235_p11 = scmp.ne.s32.totalorder %s1530_s10, %s1234_s19 }
 0x842   : > { %p1242_p1 = scmp.lt.s32.totalorder %s1240_s23, %s1234_s19 }
 0x843   : > { %v709_v61 = vpop.f32.mrf.mxu1  ;;  %p1236_p12 = pnand %p1235_p11, %p1372_p5 }
 0x844   : > { %195 = vrot.lane.b32.xlu0 %v1435_v17, %s1306_s28  ;;  %p1243_p2 = por %p1242_p1, %p1241_p0 }
 0x845   : > { %v1107_v62 = vpop.f32.mrf.mxu1  ;;  %p1237_p13 = pneg %p1236_p12 }
 0x847   : > { %v830_v63 = vpop.f32.mrf.mxu1  ;;  %p1244_p3 = pnand %p1243_p2, %p1237_p13 }
 0x848   : > { %837 = vrot.lane.b32.xlu1 %v830_v63, %s1301_s6 }
 0x849   : > { %v1118_v0 = vpop.f32.mrf.mxu1 }
 0x84b   : > { %v833_v1 = vpop.f32.mrf.mxu1 }
 0x84c   : > { %197 = vrot.lane.b32.xlu1 %v1435_v17, %s1307_s29 }
 0x84d   : > { %v1119_v2 = vpop.f32.mrf.mxu1 }
 0x8b2   : > { %v714_v21 = vpop.permute.xlu0 %713 }
 0x8b3   : > { %717 = vst.msk [vmem:[#allocation3] sm:$0xff] %vm716_vm7, %v714_v21 }
 0x8b6   : > { %v196_v9 = vpop.permute.xlu0 %195 }
 0x8ba   : > { %v838_v3 = vpop.permute.xlu1 %837 }
 0x8bb   : > { %841 = vst.msk [vmem:[#allocation3] sm:$0xff] %vm840_vm8, %v838_v3 }
 0x8be   : > { %v198_v10 = vpop.permute.xlu1 %197 }
 0x8bf   : > { %v203_v11 = vsel %vm202_vm10, %v196_v9, %v198_v10 }
 0x8c0   : > { %v204_v12 = vsub.f32 %v1435_v17, %v203_v11 }
 0x8c2   : > { %v842_v4 = vld [vmem:[#allocation3] sm:$0xff]  ;;  %v205_v14 = vmul.f32 0.5, %v204_v12 }
 0x8c3   : > { %v843_v5 = vpack.c.bf16 %v842_v4, %v842_v4 }
 0x8c5   : > { %1129 = vmatmul.mubr.msk.bf16.vlgmr.msra.gmra.mxu0 %vm883_vm9, %v843_v5 }
 0x985   : > { %v921_v15 = vpop.f32.mrf.mxu0 }
 0x986   : > { %v922_v16 = vadd.f32 %v1040_v13, %v921_v15 }
 0x987   : > { %v1130_v18 = vpop.f32.mrf.mxu0 }
 0x988   : > { %v927_v19 = vadd.f32 %v922_v16, %v205_v14 }
 0x989   : > { %v924_v17 = vpop.f32.mrf.mxu0 }
 0x98a   : > { %928 = vst [vmem:[%s188_s9] sm:$0xff] %v927_v19 }
 0x98b   : > { %v1131_v20 = vpop.f32.mrf.mxu0 }
 0x98c   : > { %1247 = shalt.err (!%p1244_p3)
}
 0x98d   : > { %s1248_s27 = scalar_lea.hbm %s1528_s13, 128  ;;  %s1252_s30 = scalar_lea.hbm %s1573_s4, 256 }
 0x98e   : > { %p1249_p4 = scmp.ne.s32.totalorder %s1528_s13, %s1248_s27  ;;  %p1253_p9 = scmp.lt.s32.totalorder %s1528_s13, %s1573_s4 }
 0x98f   : > { %p1254_p10 = scmp.lt.s32.totalorder %s1252_s30, %s1248_s27 }
 0x990   : > { %p1250_p7 = pnand %p1249_p4, %p1372_p5 }
 0x991   : > { %p1255_p11 = por %p1254_p10, %p1253_p9 }
 0x992   : > { %p1251_p8 = pneg %p1250_p7 }
 0x994   : > { %p1256_p12 = pnand %p1255_p11, %p1251_p8 }
 0x996   : > { %1259 = shalt.err (!%p1256_p12)
}
 0x997   : > { %1132 = dma.vmem_to_hbm [thread:$0]  (%p1372_p5), %s1530_s10, 128, %s1528_s13, %s930_s14  }
 0x998 PF: > { %p1138_p13 = scmp.ge.s32.totalorder %s1294_s18, 2  ;;  %s955_s7 = sand.u32 1, %s1282_s15  }
 0x999   : > { %s956_s8 = scalar_lea.sflag [#allocation5], %s955_s7 }
 0x99a   : > { %p1135_p0 = pnand %p1138_p13, %p1376_p6 }
 0x99c   : > { %p1136_p1 = pneg %p1135_p0 }
 0x99e   : > { %1277 = dma.done.wait (%p1136_p1), %s956_s8, 128  }
 0x99f   : > { %1279 = vsyncadd (%p1136_p1), %s956_s8, 4294967168  ;;  %p14_p2 = scmp.ge.s32.totalorder %s1359_s21, 4   ;;  %s1576_s15 = smov %s1286_s16 }
 0x9a0   : > { %s1577_s16 = smov %s1290_s17  ;;  %s1578_s17 = smov %s1370_s24 }
 0x9a1   : > { %s1579_s18 = smov %s1359_s21  ;;  %16 = sbr.rel (!%p14_p2) target bundleno = 3 (0x3), region = 71 }
 0x9a6   :  { %961 = vsyncpa [#allocation5], 1 }
 0x9a7   :  { %963 = vsyncpa [#allocation5 + $0x1], 1 }

</bundles_post_ra>
